<compile_context>
chip_gen: v7x
topology: tpu7x:2x2x1
jax: 0.10.0
libtpu: 0.0.40
codegen_flags: <defaults>
</compile_context>

<pallas_src>
import jax
import jax.numpy as jnp
from jax import lax
from jax.experimental import pallas as pl
from jax.experimental.pallas import tpu as pltpu

LN_EPS = 1e-6
NEG_INF = -1e9


def _group_attention_kernel(ctx_ref, prior_ref, adj_ref,
                            wqt_ref, bq_ref, wkt_ref, bk_ref,
                            gamma_ref, beta_ref,
                            g_attn_ref, neibor_ref,
                            q_sc, k_sc):
    bt, s, d = ctx_ref.shape

    # ---- LayerNorm on the fused (bt*s, d) slab (unbiased std, eps on std) ----
    x = ctx_ref[...].reshape(bt * s, d)
    mean = jnp.mean(x, axis=-1, keepdims=True)
    diff = x - mean
    var = jnp.sum(diff * diff, axis=-1, keepdims=True) * (1.0 / (d - 1))
    # approx reciprocal -> EUP slot, off the VALU critical path (review item).
    inv_std = pl.reciprocal(jnp.sqrt(var) + LN_EPS, approx=True)
    xn = gamma_ref[...] * diff * inv_std + beta_ref[...]

    # ---- fused Q/K projections: (bt*s, d) @ (d, d) bf16 MXU, f32 accumulate ----
    xn_b = xn.astype(jnp.bfloat16)
    q = jnp.dot(xn_b, wqt_ref[...], preferred_element_type=jnp.float32) + bq_ref[...]
    k = jnp.dot(xn_b, wkt_ref[...], preferred_element_type=jnp.float32) + bk_ref[...]
    # Stage into VMEM scratch so the per-sequence loop can index with a dynamic b.
    q_sc[...] = q.astype(jnp.bfloat16).reshape(bt, s, d)
    k_sc[...] = k.astype(jnp.bfloat16).reshape(bt, s, d)

    # ---- constant structural masks, hoisted out of the per-sequence loop ----
    row = lax.broadcasted_iota(jnp.int32, (s, s), 0)
    col = lax.broadcasted_iota(jnp.int32, (s, s), 1)
    diag = col == row
    a_mask = col == row + 1                     # superdiagonal
    upper = col > row
    cum_row_mask = row < col                    # picks u_{r+1} terms for c[k]
    cum_col_mask = (col <= row) & (col >= 1)    # picks u_c terms for c[i]
    scale = 2.0 / d

    # ---- per-sequence S x S phase: fori_loop bounds live ranges ----
    def body(b, carry):
        q_b = q_sc[b]                           # (s, d) bf16, dynamic index
        k_b = k_sc[b]
        # scores = q @ k^T / (d/2); contract last axes of both (no transpose)
        scores = jnp.einsum('qd,kd->qk', q_b, k_b,
                            preferred_element_type=jnp.float32) * scale
        keep = adj_ref[b].astype(jnp.int32) != 0
        scores = jnp.where(keep, scores, NEG_INF)

        m = jnp.max(scores, axis=-1, keepdims=True)
        e = jnp.exp(scores - m)
        nb = e * pl.reciprocal(jnp.sum(e, axis=-1, keepdims=True), approx=True)

        # symmetrize (the one unavoidable XLU transpose) + prior mixing
        nb = jnp.sqrt(nb * nb.T + 1e-9)
        prior = prior_ref[b]
        nb = prior + (1.0 - prior) * nb

        # ---- group attention from superdiagonal prefix sums (transpose-free) ----
        #   u_m = log(nb[m-1, m] + 1e-9),  c[k] = sum_{m<=k} u_m
        #   g[i,k] = exp(c[k] - c[i]) above the diagonal (mirrored below),
        #   g[i,i] = nb[i,i], off-diagonal gets +1e-9 — identical to the
        #   original tri-matmul formulation.
        # The superdiagonal is read out once as a column (indexed by its row)
        # and once as a row (indexed by its column), so both orientations of c
        # are produced by masked reduces — no vector or (s,s) transpose.
        sup_masked = jnp.where(a_mask, nb, 0.0)
        sup_col = jnp.sum(sup_masked, axis=1, keepdims=True)   # (s,1): nb[r, r+1]
        sup_row = jnp.sum(sup_masked, axis=0, keepdims=True)   # (1,s): nb[c-1, c]
        wlog_col = jnp.log(sup_col + 1e-9)                     # u_{r+1} as a column
        wlog_row = jnp.log(sup_row + 1e-9)                     # u_c     as a row
        c_row = jnp.sum(jnp.where(cum_row_mask, wlog_col, 0.0),
                        axis=0, keepdims=True)                 # (1,s): c[k]
        c_col = jnp.sum(jnp.where(cum_col_mask, wlog_row, 0.0),
                        axis=1, keepdims=True)                 # (s,1): c[i]

        dc = c_row - c_col                                     # dc[i,k] = c[k]-c[i]
        g_off = jnp.exp(jnp.where(upper, dc, -dc))
        g = jnp.where(diag, nb, g_off + 1e-9)

        g_attn_ref[b] = g
        neibor_ref[b] = nb
        return carry

    lax.fori_loop(0, bt, body, 0)


def _vmem_capacity_bytes():
    try:
        info = pltpu.get_tpu_info()
        cap = getattr(info, "vmem_capacity_bytes", None)
        if cap:
            return int(cap)
    except Exception:
        pass
    return 64 << 20   # conservative fallback (v7x); v5e/v6e have 128 MiB


def _block_vmem_bytes(bb, s, d):
    """Heuristic per-step VMEM footprint (double-buffered blocks + scratch + temps)."""
    f32, bf16, i8 = 4, 2, 1
    dbl = 2  # BlockSpec double-buffering
    blocks = dbl * (bb * s * d * f32            # context block
                    + bb * s * s * (f32 + i8)   # prior (f32) + adj (int8)
                    + 2 * bb * s * s * f32      # two output blocks
                    + 2 * d * d * bf16          # W_q^T / W_k^T
                    + 6 * d * f32)              # biases + LN vectors
    scratch = 2 * bb * s * d * bf16             # q/k staging
    temps = 3 * bb * s * d * f32 + 12 * s * s * f32   # LN temps + one sequence's 2-D temps
    return blocks + scratch + temps


def _choose_block_b(batch, s, d, vmem_cap):
    """Largest block_b that (a) targets M ~ 256 rows for the fused projection
    matmul (v6e/v7x 256-wide MXU; harmless on v5e) and (b) fits the VMEM budget.
    No >=2-grid-steps constraint (megacore sharding only matters on v7x and the
    extra steps just cost pipeline overhead on single-TC chips)."""
    budget = int(0.55 * vmem_cap)
    bb = max(1, min(batch, -(-256 // s)))
    while bb > 1 and _block_vmem_bytes(bb, s, d) > budget:
        bb -= 1
    return bb


def group_attention(context, eos_mask, prior, adj_mat, params, *, block_b=None):
    # eos_mask is accepted for API parity with the PyTorch module but unused in
    # its forward; dropout is defined there but never applied in forward either.
    del eos_mask
    B, S, D = context.shape
    vmem_cap = _vmem_capacity_bytes()
    if block_b is None:
        block_b = _choose_block_b(B, S, D, vmem_cap)
    block_b = max(1, int(block_b))

    context = jnp.asarray(context, jnp.float32)
    prior = jnp.asarray(prior, jnp.float32)
    adj_i8 = (jnp.asarray(adj_mat) != 0).astype(jnp.int8)   # only compared to 0

    # Pad the batch to a multiple of block_b (padded rows are numerically safe:
    # zero context + fully-masked adjacency never produce NaNs) instead of
    # shrinking block_b for odd/prime B.
    Bp = -(-B // block_b) * block_b
    if Bp != B:
        pad = Bp - B
        context = jnp.concatenate(
            [context, jnp.zeros((pad, S, D), context.dtype)], axis=0)
        prior = jnp.concatenate(
            [prior, jnp.zeros((pad, S, S), prior.dtype)], axis=0)
        adj_i8 = jnp.concatenate(
            [adj_i8, jnp.zeros((pad, S, S), adj_i8.dtype)], axis=0)
    num_blocks = Bp // block_b

    # PyTorch nn.Linear stores W as (out, in); pre-transpose in the wrapper so
    # the kernel never transposes, and cast to bf16 (f32 accumulation in-kernel).
    wqT = jnp.asarray(params["wq"]).T.astype(jnp.bfloat16)
    wkT = jnp.asarray(params["wk"]).T.astype(jnp.bfloat16)
    bq = jnp.asarray(params["bq"], jnp.float32).reshape(1, D)
    bk = jnp.asarray(params["bk"], jnp.float32).reshape(1, D)
    gamma = jnp.asarray(params["gamma"], jnp.float32).reshape(1, D)
    beta = jnp.asarray(params["beta"], jnp.float32).reshape(1, D)

    bmap3 = lambda b: (b, 0, 0)
    zmap2 = lambda b: (0, 0)

    est_bytes = _block_vmem_bytes(block_b, S, D)
    vmem_limit = int(min(max(2 * est_bytes, 32 << 20), int(0.6 * vmem_cap)))

    g_attn, neibor = pl.pallas_call(
        _group_attention_kernel,
        out_shape=(jax.ShapeDtypeStruct((Bp, S, S), jnp.float32),
                   jax.ShapeDtypeStruct((Bp, S, S), jnp.float32)),
        grid_spec=pltpu.PrefetchScalarGridSpec(
            num_scalar_prefetch=0,
            grid=(num_blocks,),
            in_specs=[
                pl.BlockSpec((block_b, S, D), bmap3),   # context
                pl.BlockSpec((block_b, S, S), bmap3),   # prior (f32)
                pl.BlockSpec((block_b, S, S), bmap3),   # adj_mat (int8)
                pl.BlockSpec((D, D), zmap2),            # W_query^T (bf16)
                pl.BlockSpec((1, D), zmap2),            # b_query
                pl.BlockSpec((D, D), zmap2),            # W_key^T (bf16)
                pl.BlockSpec((1, D), zmap2),            # b_key
                pl.BlockSpec((1, D), zmap2),            # LayerNorm a_2
                pl.BlockSpec((1, D), zmap2),            # LayerNorm b_2
            ],
            out_specs=(pl.BlockSpec((block_b, S, S), bmap3),
                       pl.BlockSpec((block_b, S, S), bmap3)),
            scratch_shapes=[
                pltpu.VMEM((block_b, S, D), jnp.bfloat16),   # q staging
                pltpu.VMEM((block_b, S, D), jnp.bfloat16),   # k staging
            ],
        ),
        compiler_params=pltpu.CompilerParams(
            dimension_semantics=("parallel",),
            vmem_limit_bytes=vmem_limit),
    )(context, prior, adj_i8, wqT, bq, wkT, bk, gamma, beta)

    if Bp != B:
        g_attn = g_attn[:B]
        neibor = neibor[:B]
    return g_attn, neibor


def group_attention_ref(context, prior, adj_mat, params):
    """Pure-JAX reference mirroring the PyTorch forward (original formulation)."""
    B, S, D = context.shape
    mean = jnp.mean(context, axis=-1, keepdims=True)
    diff = context - mean
    var = jnp.sum(diff * diff, axis=-1, keepdims=True) / (D - 1)
    xn = params["gamma"] * diff / (jnp.sqrt(var) + LN_EPS) + params["beta"]

    hp = lax.Precision.HIGHEST
    q = jnp.einsum("bsd,ed->bse", xn, params["wq"], precision=hp) + params["bq"]
    k = jnp.einsum("bsd,ed->bse", xn, params["wk"], precision=hp) + params["bk"]
    scores = jnp.einsum("bqd,bkd->bqk", q, k, precision=hp) / (D / 2.0)
    scores = jnp.where(adj_mat == 0, NEG_INF, scores)
    neibor = jax.nn.softmax(scores, axis=-1)
    neibor = jnp.sqrt(neibor * jnp.swapaxes(neibor, -2, -1) + 1e-9)
    neibor = prior + (1.0 - prior) * neibor

    idx = jnp.arange(S)
    a_mask = (idx[None, :] == idx[:, None] + 1)
    diag = (idx[:, None] == idx[None, :])
    tri = (idx[None, :] >= idx[:, None]).astype(jnp.float32)

    t = jnp.where(a_mask, jnp.log(neibor + 1e-9), 0.0)
    t = jnp.einsum("bij,jk->bik", t, tri, precision=hp)
    g = jnp.exp(jnp.einsum("ij,bjk->bik", tri, t, precision=hp))
    g = jnp.where(idx[None, :] > idx[:, None], g, 0.0)
    g = g + jnp.swapaxes(g, -2, -1) + jnp.where(diag, neibor, 1e-9)
    return g, neibor


def _make_inputs(B, S, D, key):
    k1, k2, k3, k4, k5, k6, k7 = jax.random.split(key, 7)
    context = jax.random.normal(k1, (B, S, D), jnp.float32)
    prior = jax.random.uniform(k2, (B, S, S), jnp.float32, 0.0, 0.5)
    # tridiagonal adjacency (each token attends to itself and its neighbours)
    idx = jnp.arange(S)
    adj_mat = jnp.broadcast_to(
        (jnp.abs(idx[:, None] - idx[None, :]) <= 1).astype(jnp.float32), (B, S, S))
    eos_mask = jnp.ones((B, S), jnp.float32)  # unused by forward
    params = {
        "wq": 0.1 * jax.random.normal(k3, (D, D), jnp.float32),
        "bq": 0.1 * jax.random.normal(k4, (D,), jnp.float32),
        "wk": 0.1 * jax.random.normal(k5, (D, D), jnp.float32),
        "bk": 0.1 * jax.random.normal(k6, (D,), jnp.float32),
        "gamma": jnp.ones((D,), jnp.float32) + 0.05 * jax.random.normal(k7, (D,), jnp.float32),
        "beta": jnp.zeros((D,), jnp.float32),
    }
    return context, eos_mask, prior, adj_mat, params


if __name__ == "__main__":
    key = jax.random.PRNGKey(0)
    keys = jax.random.split(key, 4)

    cases = [
        dict(B=2, S=8, D=32, block_b=None),   # default planning, single block
        dict(B=4, S=8, D=32, block_b=None),   # larger fused batch
        dict(B=5, S=8, D=32, block_b=2),      # padded batch + multi-step grid
        dict(B=3, S=16, D=64, block_b=None),  # different S / D
    ]

    for case_key, case in zip(keys, cases):
        B, S, D, bb = case["B"], case["S"], case["D"], case["block_b"]
        context, eos_mask, prior, adj_mat, params = _make_inputs(B, S, D, case_key)

        g_attn, neibor = group_attention(context, eos_mask, prior, adj_mat, params,
                                         block_b=bb)
        jax.block_until_ready((g_attn, neibor))

        g_ref, n_ref = group_attention_ref(context, prior, adj_mat, params)
        assert g_attn.shape == (B, S, S) and neibor.shape == (B, S, S)
        assert jnp.allclose(g_attn, g_ref, rtol=2e-2, atol=3e-3), \
            f"g_attn mismatch for B={B}, S={S}, D={D}"
        assert jnp.allclose(neibor, n_ref, rtol=2e-2, atol=3e-3), \
            f"neibor_attn mismatch for B={B}, S={S}, D={D}"

    print("KERNEL_OK")
</pallas_src>

<mosaic_0001>
module attributes {stable_mosaic.version = 11 : i64} {
  func.func @_group_attention_kernel(%arg0: i32, %arg1: memref<2x8x32xf32, #tpu.memory_space<vmem>>, %arg2: memref<2x8x8xf32, #tpu.memory_space<vmem>>, %arg3: memref<2x8x8xi8, #tpu.memory_space<vmem>>, %arg4: memref<32x32xbf16, #tpu.memory_space<vmem>>, %arg5: memref<1x32xf32, #tpu.memory_space<vmem>>, %arg6: memref<32x32xbf16, #tpu.memory_space<vmem>>, %arg7: memref<1x32xf32, #tpu.memory_space<vmem>>, %arg8: memref<1x32xf32, #tpu.memory_space<vmem>>, %arg9: memref<1x32xf32, #tpu.memory_space<vmem>>, %arg10: memref<2x8x8xf32, #tpu.memory_space<vmem>>, %arg11: memref<2x8x8xf32, #tpu.memory_space<vmem>>, %arg12: memref<2x8x32xbf16, #tpu.memory_space<vmem>>, %arg13: memref<2x8x32xbf16, #tpu.memory_space<vmem>>) attributes {dimension_semantics = [#tpu.dimension_semantics<parallel>], iteration_bounds = array<i64: 1>, scalar_prefetch = 0 : i64, scratch_operands = 2 : i64, tpu.core_type = #tpu.core_type<tc>, window_params = [{transform_indices = @transform_0, window_bounds = array<i64: 2, 8, 32>}, {transform_indices = @transform_1, window_bounds = array<i64: 2, 8, 8>}, {transform_indices = @transform_2, window_bounds = array<i64: 2, 8, 8>}, {pipeline_mode = #tpu.pipeline_mode<synchronous>, transform_indices = @transform_3, window_bounds = array<i64: 32, 32>}, {pipeline_mode = #tpu.pipeline_mode<synchronous>, transform_indices = @transform_4, window_bounds = array<i64: 1, 32>}, {pipeline_mode = #tpu.pipeline_mode<synchronous>, transform_indices = @transform_5, window_bounds = array<i64: 32, 32>}, {pipeline_mode = #tpu.pipeline_mode<synchronous>, transform_indices = @transform_6, window_bounds = array<i64: 1, 32>}, {pipeline_mode = #tpu.pipeline_mode<synchronous>, transform_indices = @transform_7, window_bounds = array<i64: 1, 32>}, {pipeline_mode = #tpu.pipeline_mode<synchronous>, transform_indices = @transform_8, window_bounds = array<i64: 1, 32>}, {transform_indices = @transform_9, window_bounds = array<i64: 2, 8, 8>}, {transform_indices = @transform_10, window_bounds = array<i64: 2, 8, 8>}]} {
    %c0 = arith.constant 0 : index
    %c0_0 = arith.constant 0 : index
    %c0_1 = arith.constant 0 : index
    %0 = vector.load %arg1[%c0, %c0_0, %c0_1] : memref<2x8x32xf32, #tpu.memory_space<vmem>>, vector<2x8x32xf32>
    %1 = vector.shape_cast %0 : vector<2x8x32xf32> to vector<16x32xf32>
    %cst = arith.constant dense<0.000000e+00> : vector<16xf32>
    %2 = vector.multi_reduction <add>, %1, %cst [1] : vector<16x32xf32> to vector<16xf32>
    %3 = vector.shape_cast %2 : vector<16xf32> to vector<16x1xf32>
    %cst_2 = arith.constant 3.200000e+01 : f32
    %4 = vector.broadcast %cst_2 : f32 to vector<16x1xf32>
    %5 = arith.divf %3, %4 : vector<16x1xf32>
    %6 = vector.broadcast %5 : vector<16x1xf32> to vector<16x32xf32>
    %7 = arith.subf %1, %6 : vector<16x32xf32>
    %8 = arith.mulf %7, %7 : vector<16x32xf32>
    %cst_3 = arith.constant dense<0.000000e+00> : vector<16xf32>
    %9 = vector.multi_reduction <add>, %8, %cst_3 [1] : vector<16x32xf32> to vector<16xf32>
    %10 = vector.shape_cast %9 : vector<16xf32> to vector<16x1xf32>
    %cst_4 = arith.constant 0.0322580636 : f32
    %11 = vector.broadcast %cst_4 : f32 to vector<16x1xf32>
    %12 = arith.mulf %10, %11 : vector<16x1xf32>
    %13 = math.sqrt %12 : vector<16x1xf32>
    %cst_5 = arith.constant 9.99999997E-7 : f32
    %14 = vector.broadcast %cst_5 : f32 to vector<16x1xf32>
    %15 = arith.addf %13, %14 : vector<16x1xf32>
    %16 = tpu.reciprocal %15 {approx = true} : vector<16x1xf32> -> vector<16x1xf32>
    %c0_6 = arith.constant 0 : index
    %c0_7 = arith.constant 0 : index
    %17 = vector.load %arg8[%c0_6, %c0_7] : memref<1x32xf32, #tpu.memory_space<vmem>>, vector<1x32xf32>
    %18 = vector.broadcast %17 : vector<1x32xf32> to vector<16x32xf32>
    %19 = arith.mulf %18, %7 : vector<16x32xf32>
    %20 = vector.broadcast %16 : vector<16x1xf32> to vector<16x32xf32>
    %21 = arith.mulf %19, %20 : vector<16x32xf32>
    %c0_8 = arith.constant 0 : index
    %c0_9 = arith.constant 0 : index
    %22 = vector.load %arg9[%c0_8, %c0_9] : memref<1x32xf32, #tpu.memory_space<vmem>>, vector<1x32xf32>
    %23 = vector.broadcast %22 : vector<1x32xf32> to vector<16x32xf32>
    %24 = arith.addf %21, %23 : vector<16x32xf32>
    %25 = arith.truncf %24 : vector<16x32xf32> to vector<16x32xbf16>
    %c0_10 = arith.constant 0 : index
    %c0_11 = arith.constant 0 : index
    %26 = vector.load %arg4[%c0_10, %c0_11] : memref<32x32xbf16, #tpu.memory_space<vmem>>, vector<32x32xbf16>
    %cst_12 = arith.constant dense<0.000000e+00> : vector<16x32xf32>
    %27 = tpu.matmul %25, %26, %cst_12 {dimension_numbers = #tpu.dot_dimension_numbers<[1], [0], [0], [1], [0, 0, 1, 1], [], []>} : vector<16x32xbf16>, vector<32x32xbf16>, vector<16x32xf32> -> vector<16x32xf32>
    %c0_13 = arith.constant 0 : index
    %c0_14 = arith.constant 0 : index
    %28 = vector.load %arg5[%c0_13, %c0_14] : memref<1x32xf32, #tpu.memory_space<vmem>>, vector<1x32xf32>
    %29 = vector.broadcast %28 : vector<1x32xf32> to vector<16x32xf32>
    %30 = arith.addf %27, %29 : vector<16x32xf32>
    %c0_15 = arith.constant 0 : index
    %c0_16 = arith.constant 0 : index
    %31 = vector.load %arg6[%c0_15, %c0_16] : memref<32x32xbf16, #tpu.memory_space<vmem>>, vector<32x32xbf16>
    %cst_17 = arith.constant dense<0.000000e+00> : vector<16x32xf32>
    %32 = tpu.matmul %25, %31, %cst_17 {dimension_numbers = #tpu.dot_dimension_numbers<[1], [0], [0], [1], [0, 0, 1, 1], [], []>} : vector<16x32xbf16>, vector<32x32xbf16>, vector<16x32xf32> -> vector<16x32xf32>
    %c0_18 = arith.constant 0 : index
    %c0_19 = arith.constant 0 : index
    %33 = vector.load %arg7[%c0_18, %c0_19] : memref<1x32xf32, #tpu.memory_space<vmem>>, vector<1x32xf32>
    %34 = vector.broadcast %33 : vector<1x32xf32> to vector<16x32xf32>
    %35 = arith.addf %32, %34 : vector<16x32xf32>
    %36 = arith.truncf %30 : vector<16x32xf32> to vector<16x32xbf16>
    %37 = vector.shape_cast %36 : vector<16x32xbf16> to vector<2x8x32xbf16>
    %c0_20 = arith.constant 0 : index
    %c0_21 = arith.constant 0 : index
    %c0_22 = arith.constant 0 : index
    %38 = vector.load %arg12[%c0_20, %c0_21, %c0_22] : memref<2x8x32xbf16, #tpu.memory_space<vmem>>, vector<2x8x32xbf16>
    tpu.vector_store %arg12[%c0_20, %c0_21, %c0_22], %37 {strides = array<i32>} : memref<2x8x32xbf16, #tpu.memory_space<vmem>>, vector<2x8x32xbf16>,
    %39 = arith.truncf %35 : vector<16x32xf32> to vector<16x32xbf16>
    %40 = vector.shape_cast %39 : vector<16x32xbf16> to vector<2x8x32xbf16>
    %c0_23 = arith.constant 0 : index
    %c0_24 = arith.constant 0 : index
    %c0_25 = arith.constant 0 : index
    %41 = vector.load %arg13[%c0_23, %c0_24, %c0_25] : memref<2x8x32xbf16, #tpu.memory_space<vmem>>, vector<2x8x32xbf16>
    tpu.vector_store %arg13[%c0_23, %c0_24, %c0_25], %40 {strides = array<i32>} : memref<2x8x32xbf16, #tpu.memory_space<vmem>>, vector<2x8x32xbf16>,
    %42 = tpu.iota {dimensions = array<i32: 0>} : vector<8x8xi32>
    %43 = tpu.iota {dimensions = array<i32: 1>} : vector<8x8xi32>
    %44 = arith.cmpi eq, %43, %42 : vector<8x8xi32>
    %c1_i32 = arith.constant 1 : i32
    %45 = vector.broadcast %c1_i32 : i32 to vector<8x8xi32>
    %46 = arith.addi %42, %45 : vector<8x8xi32>
    %47 = arith.cmpi eq, %43, %46 : vector<8x8xi32>
    %48 = arith.cmpi sgt, %43, %42 : vector<8x8xi32>
    %49 = arith.cmpi slt, %42, %43 : vector<8x8xi32>
    %50 = arith.cmpi sle, %43, %42 : vector<8x8xi32>
    %c1_i32_26 = arith.constant 1 : i32
    %51 = vector.broadcast %c1_i32_26 : i32 to vector<8x8xi32>
    %52 = arith.cmpi sge, %43, %51 : vector<8x8xi32>
    %53 = arith.andi %50, %52 : vector<8x8xi1>
    %c0_i32 = arith.constant 0 : i32
    %c2_i32 = arith.constant 2 : i32
    %54 = arith.addi %c0_i32, %c2_i32 : i32
    %c1_i32_27 = arith.constant 1 : i32
    scf.for %arg14 = %c0_i32 to %54 step %c1_i32_27  : i32 {
      %55 = arith.index_cast %arg14 : i32 to index
      %c0_29 = arith.constant 0 : index
      %c0_30 = arith.constant 0 : index
      %56 = vector.load %arg12[%55, %c0_29, %c0_30] : memref<2x8x32xbf16, #tpu.memory_space<vmem>>, vector<1x8x32xbf16>
      %57 = vector.shape_cast %56 : vector<1x8x32xbf16> to vector<8x32xbf16>
      %58 = arith.index_cast %arg14 : i32 to index
      %c0_31 = arith.constant 0 : index
      %c0_32 = arith.constant 0 : index
      %59 = vector.load %arg13[%58, %c0_31, %c0_32] : memref<2x8x32xbf16, #tpu.memory_space<vmem>>, vector<1x8x32xbf16>
      %60 = vector.shape_cast %59 : vector<1x8x32xbf16> to vector<8x32xbf16>
      "tpu.trace_start"() <{level = 10 : i32, message = "qd,kd->qk"}> : () -> ()
      %cst_33 = arith.constant dense<0.000000e+00> : vector<8x8xf32>
      %61 = tpu.matmul %57, %60, %cst_33 {dimension_numbers = #tpu.dot_dimension_numbers<[1], [1], [0], [0], [0, 0, 1, 0], [], []>} : vector<8x32xbf16>, vector<8x32xbf16>, vector<8x8xf32> -> vector<8x8xf32>
      "tpu.trace_stop"() : () -> ()
      %cst_34 = arith.constant 6.250000e-02 : f32
      %62 = vector.broadcast %cst_34 : f32 to vector<8x8xf32>
      %63 = arith.mulf %61, %62 : vector<8x8xf32>
      %64 = arith.index_cast %arg14 : i32 to index
      %c0_35 = arith.constant 0 : index
      %c0_36 = arith.constant 0 : index
      %65 = vector.load %arg3[%64, %c0_35, %c0_36] : memref<2x8x8xi8, #tpu.memory_space<vmem>>, vector<1x8x8xi8>
      %66 = vector.shape_cast %65 : vector<1x8x8xi8> to vector<8x8xi8>
      %67 = arith.extsi %66 : vector<8x8xi8> to vector<8x8xi32>
      %c0_i32_37 = arith.constant 0 : i32
      %68 = vector.broadcast %c0_i32_37 : i32 to vector<8x8xi32>
      %69 = arith.cmpi ne, %67, %68 : vector<8x8xi32>
      %cst_38 = arith.constant -1.000000e+09 : f32
      %70 = vector.broadcast %cst_38 : f32 to vector<8x8xf32>
      %71 = arith.select %69, %63, %70 : vector<8x8xi1>, vector<8x8xf32>
      %cst_39 = arith.constant dense<0xFF800000> : vector<8xf32>
      %72 = vector.multi_reduction <maximumf>, %71, %cst_39 [1] : vector<8x8xf32> to vector<8xf32>
      %73 = vector.shape_cast %72 : vector<8xf32> to vector<8x1xf32>
      %74 = vector.broadcast %73 : vector<8x1xf32> to vector<8x8xf32>
      %75 = arith.subf %71, %74 : vector<8x8xf32>
      %76 = math.exp %75 : vector<8x8xf32>
      %cst_40 = arith.constant dense<0.000000e+00> : vector<8xf32>
      %77 = vector.multi_reduction <add>, %76, %cst_40 [1] : vector<8x8xf32> to vector<8xf32>
      %78 = vector.shape_cast %77 : vector<8xf32> to vector<8x1xf32>
      %79 = tpu.reciprocal %78 {approx = true} : vector<8x1xf32> -> vector<8x1xf32>
      %80 = vector.broadcast %79 : vector<8x1xf32> to vector<8x8xf32>
      %81 = arith.mulf %76, %80 : vector<8x8xf32>
      %82 = tpu.transpose %81, [1, 0] : vector<8x8xf32> -> vector<8x8xf32>
      %83 = arith.mulf %81, %82 : vector<8x8xf32>
      %cst_41 = arith.constant 9.99999971E-10 : f32
      %84 = vector.broadcast %cst_41 : f32 to vector<8x8xf32>
      %85 = arith.addf %83, %84 : vector<8x8xf32>
      %86 = math.sqrt %85 : vector<8x8xf32>
      %87 = arith.index_cast %arg14 : i32 to index
      %c0_42 = arith.constant 0 : index
      %c0_43 = arith.constant 0 : index
      %88 = vector.load %arg2[%87, %c0_42, %c0_43] : memref<2x8x8xf32, #tpu.memory_space<vmem>>, vector<1x8x8xf32>
      %89 = vector.shape_cast %88 : vector<1x8x8xf32> to vector<8x8xf32>
      %cst_44 = arith.constant 1.000000e+00 : f32
      %90 = vector.broadcast %cst_44 : f32 to vector<8x8xf32>
      %91 = arith.subf %90, %89 : vector<8x8xf32>
      %92 = arith.mulf %91, %86 : vector<8x8xf32>
      %93 = arith.addf %89, %92 : vector<8x8xf32>
      %cst_45 = arith.constant 0.000000e+00 : f32
      %94 = vector.broadcast %cst_45 : f32 to vector<8x8xf32>
      %95 = arith.select %47, %93, %94 : vector<8x8xi1>, vector<8x8xf32>
      %cst_46 = arith.constant dense<0.000000e+00> : vector<8xf32>
      %96 = vector.multi_reduction <add>, %95, %cst_46 [1] : vector<8x8xf32> to vector<8xf32>
      %97 = vector.shape_cast %96 : vector<8xf32> to vector<8x1xf32>
      %cst_47 = arith.constant dense<0.000000e+00> : vector<8xf32>
      %98 = vector.multi_reduction <add>, %95, %cst_47 [0] : vector<8x8xf32> to vector<8xf32>
      %99 = vector.shape_cast %98 : vector<8xf32> to vector<1x8xf32>
      %cst_48 = arith.constant 9.99999971E-10 : f32
      %100 = vector.broadcast %cst_48 : f32 to vector<8x1xf32>
      %101 = arith.addf %97, %100 : vector<8x1xf32>
      %102 = math.log %101 : vector<8x1xf32>
      %cst_49 = arith.constant 9.99999971E-10 : f32
      %103 = vector.broadcast %cst_49 : f32 to vector<1x8xf32>
      %104 = arith.addf %99, %103 : vector<1x8xf32>
      %105 = math.log %104 : vector<1x8xf32>
      %cst_50 = arith.constant 0.000000e+00 : f32
      %106 = vector.shape_cast %102 : vector<8x1xf32> to vector<8x1xf32>
      %107 = vector.broadcast %106 : vector<8x1xf32> to vector<8x8xf32>
      %108 = vector.broadcast %cst_50 : f32 to vector<8x8xf32>
      %109 = arith.select %49, %107, %108 : vector<8x8xi1>, vector<8x8xf32>
      %cst_51 = arith.constant dense<0.000000e+00> : vector<8xf32>
      %110 = vector.multi_reduction <add>, %109, %cst_51 [0] : vector<8x8xf32> to vector<8xf32>
      %111 = vector.shape_cast %110 : vector<8xf32> to vector<1x8xf32>
      %cst_52 = arith.constant 0.000000e+00 : f32
      %112 = vector.shape_cast %105 : vector<1x8xf32> to vector<1x8xf32>
      %113 = vector.broadcast %112 : vector<1x8xf32> to vector<8x8xf32>
      %114 = vector.broadcast %cst_52 : f32 to vector<8x8xf32>
      %115 = arith.select %53, %113, %114 : vector<8x8xi1>, vector<8x8xf32>
      %cst_53 = arith.constant dense<0.000000e+00> : vector<8xf32>
      %116 = vector.multi_reduction <add>, %115, %cst_53 [1] : vector<8x8xf32> to vector<8xf32>
      %117 = vector.shape_cast %116 : vector<8xf32> to vector<8x1xf32>
      %118 = vector.broadcast %111 : vector<1x8xf32> to vector<8x8xf32>
      %119 = vector.broadcast %117 : vector<8x1xf32> to vector<8x8xf32>
      %120 = arith.subf %118, %119 : vector<8x8xf32>
      %cst_54 = arith.constant 0.000000e+00 : f32
      %121 = vector.broadcast %cst_54 : f32 to vector<8x8xf32>
      %122 = arith.subf %121, %120 : vector<8x8xf32>
      %123 = arith.select %48, %120, %122 : vector<8x8xi1>, vector<8x8xf32>
      %124 = math.exp %123 : vector<8x8xf32>
      %cst_55 = arith.constant 9.99999971E-10 : f32
      %125 = vector.broadcast %cst_55 : f32 to vector<8x8xf32>
      %126 = arith.addf %124, %125 : vector<8x8xf32>
      %127 = arith.select %44, %93, %126 : vector<8x8xi1>, vector<8x8xf32>
      %128 = arith.index_cast %arg14 : i32 to index
      %c0_56 = arith.constant 0 : index
      %c0_57 = arith.constant 0 : index
      %129 = vector.load %arg10[%128, %c0_56, %c0_57] : memref<2x8x8xf32, #tpu.memory_space<vmem>>, vector<1x8x8xf32>
      %130 = vector.shape_cast %129 : vector<1x8x8xf32> to vector<8x8xf32>
      %131 = vector.shape_cast %127 : vector<8x8xf32> to vector<1x8x8xf32>
      tpu.vector_store %arg10[%128, %c0_56, %c0_57], %131 {strides = array<i32>} : memref<2x8x8xf32, #tpu.memory_space<vmem>>, vector<1x8x8xf32>,
      %132 = arith.index_cast %arg14 : i32 to index
      %c0_58 = arith.constant 0 : index
      %c0_59 = arith.constant 0 : index
      %133 = vector.load %arg11[%132, %c0_58, %c0_59] : memref<2x8x8xf32, #tpu.memory_space<vmem>>, vector<1x8x8xf32>
      %134 = vector.shape_cast %133 : vector<1x8x8xf32> to vector<8x8xf32>
      %135 = vector.shape_cast %93 : vector<8x8xf32> to vector<1x8x8xf32>
      tpu.vector_store %arg11[%132, %c0_58, %c0_59], %135 {strides = array<i32>} : memref<2x8x8xf32, #tpu.memory_space<vmem>>, vector<1x8x8xf32>,
    }
    %c2_i32_28 = arith.constant 2 : i32
    return
  }
  func.func @transform_0(%arg0: i32) -> (i32, i32, i32) {
    %c0_i32 = arith.constant 0 : i32
    %c0_i32_0 = arith.constant 0 : i32
    %c0_i32_1 = arith.constant 0 : i32
    return %arg0, %c0_i32, %c0_i32_0 : i32, i32, i32
  }
  func.func @transform_1(%arg0: i32) -> (i32, i32, i32) {
    %c0_i32 = arith.constant 0 : i32
    %c0_i32_0 = arith.constant 0 : i32
    %c0_i32_1 = arith.constant 0 : i32
    return %arg0, %c0_i32, %c0_i32_0 : i32, i32, i32
  }
  func.func @transform_2(%arg0: i32) -> (i32, i32, i32) {
    %c0_i32 = arith.constant 0 : i32
    %c0_i32_0 = arith.constant 0 : i32
    %c0_i32_1 = arith.constant 0 : i32
    return %arg0, %c0_i32, %c0_i32_0 : i32, i32, i32
  }
  func.func @transform_3(%arg0: i32) -> (i32, i32) {
    %c0_i32 = arith.constant 0 : i32
    %c0_i32_0 = arith.constant 0 : i32
    %c0_i32_1 = arith.constant 0 : i32
    return %c0_i32, %c0_i32_0 : i32, i32
  }
  func.func @transform_4(%arg0: i32) -> (i32, i32) {
    %c0_i32 = arith.constant 0 : i32
    %c0_i32_0 = arith.constant 0 : i32
    %c0_i32_1 = arith.constant 0 : i32
    return %c0_i32, %c0_i32_0 : i32, i32
  }
  func.func @transform_5(%arg0: i32) -> (i32, i32) {
    %c0_i32 = arith.constant 0 : i32
    %c0_i32_0 = arith.constant 0 : i32
    %c0_i32_1 = arith.constant 0 : i32
    return %c0_i32, %c0_i32_0 : i32, i32
  }
  func.func @transform_6(%arg0: i32) -> (i32, i32) {
    %c0_i32 = arith.constant 0 : i32
    %c0_i32_0 = arith.constant 0 : i32
    %c0_i32_1 = arith.constant 0 : i32
    return %c0_i32, %c0_i32_0 : i32, i32
  }
  func.func @transform_7(%arg0: i32) -> (i32, i32) {
    %c0_i32 = arith.constant 0 : i32
    %c0_i32_0 = arith.constant 0 : i32
    %c0_i32_1 = arith.constant 0 : i32
    return %c0_i32, %c0_i32_0 : i32, i32
  }
  func.func @transform_8(%arg0: i32) -> (i32, i32) {
    %c0_i32 = arith.constant 0 : i32
    %c0_i32_0 = arith.constant 0 : i32
    %c0_i32_1 = arith.constant 0 : i32
    return %c0_i32, %c0_i32_0 : i32, i32
  }
  func.func @transform_9(%arg0: i32) -> (i32, i32, i32) {
    %c0_i32 = arith.constant 0 : i32
    %c0_i32_0 = arith.constant 0 : i32
    %c0_i32_1 = arith.constant 0 : i32
    return %arg0, %c0_i32, %c0_i32_0 : i32, i32, i32
  }
  func.func @transform_10(%arg0: i32) -> (i32, i32, i32) {
    %c0_i32 = arith.constant 0 : i32
    %c0_i32_0 = arith.constant 0 : i32
    %c0_i32_1 = arith.constant 0 : i32
    return %arg0, %c0_i32, %c0_i32_0 : i32, i32, i32
  }
}

</mosaic_0001>

<bundles_post_ra>
// kernel: tpu_custom_call.1
= control target key start
LH: loop header
LB: loop body
LE: loop exit
PB: predicated region body
PF: predicated region fallthrough
CT: control target
= control target key end

     0   :  { %16 = vsyncpa [#allocation5], 0  ;;  %s1039_s0 = inlined_call_operand.hbm [shape: f32[2,8,32], index: 0, kind: input, shape index: {}]   ;;  %s1040_s1 = inlined_call_operand.hbm [shape: f32[2,8,8], index: 1, kind: input, shape index: {}]   ;;  %s1041_s2 = inlined_call_operand.hbm [shape: s8[2,8,8], index: 2, kind: input, shape index: {}]   ;;  %s1042_s3 = inlined_call_operand.hbm [shape: bf16[32,32], index: 3, kind: input, shape index: {}]   ;;  %s1043_s4 = inlined_call_operand.vmem [shape: f32[1,32], index: 4, kind: input, shape index: {}]   ;;  %s1044_s5 = inlined_call_operand.vmem [shape: bf16[32,32], index: 5, kind: input, shape index: {}]   ;;  %s1045_s6 = inlined_call_operand.vmem [shape: f32[1,32], index: 6, kind: input, shape index: {}]   ;;  %s1046_s7 = inlined_call_operand.vmem [shape: f32[1,32], index: 7, kind: input, shape index: {}]   ;;  %s1047_s8 = inlined_call_operand.vmem [shape: f32[1,32], index: 8, kind: input, shape index: {}]   ;;  %s1048_s9 = inlined_call_operand.hbm [shape: f32[2,8,8], index: 9, kind: output, shape index: {0}]   ;;  %s1049_s10 = inlined_call_operand.hbm [shape: f32[2,8,8], index: 10, kind: output, shape index: {1}]  }
   0x1   :  { %17 = vsyncpa [#allocation8], 0 }
   0x2   :  { %18 = vsyncpa [#allocation11], 0 }
   0x3   :  { %19 = vsyncpa [#allocation6], 0 }
   0x4   :  { %20 = vsyncpa [#allocation14], 0  ;;  %s785_s13 = smov [#allocation7]   ;;  %s786_s15 = smov [#allocation4]  }
   0x5   :  { %s38_s14 = sshll.u32 %s785_s13, 4  ;;  %s26_s16 = sshll.u32 %s786_s15, 4  ;;  %s39_s14 = int_to_ptr.vmem [resolvable:$true] %s38_s14  ;;  %s856_s16 = int_to_ptr.vmem [resolvable:$true] %s26_s16 }
   0x6   :  { %s635_s19 = scalar_lea.hbm %s1040_s1, 256 }
   0x7   :  { %p636_p0 = scmp.ne.s32.totalorder %s1040_s1, %s635_s19  ;;  %p639_p1 = scmp.lt.u32.totalorder %s635_s19, %s1040_s1 }
   0x9   :  { %p641_p2 = pnand %p639_p1, %p636_p0 }
   0xb   :  { %644 = shalt.err (!%p641_p2)
}
   0xc   :  { %s645_s24 = scalar_lea.vmem %s39_s14, 256  ;;  %p650_p4 = scmp.lt.s32.totalorder %s39_s14, %s39_s14 }
   0xd   :  { %p646_p3 = scmp.ne.s32.totalorder %s39_s14, %s645_s24  ;;  %p651_p5 = scmp.lt.s32.totalorder %s645_s24, %s645_s24 }
   0xf   :  { %p652_p6 = por %p651_p5, %p650_p4 }
  0x11   :  { %p653_p7 = pnand %p652_p6, %p646_p3 }
  0x13   :  { %656 = shalt.err (!%p653_p7)
}
  0x14   :  { %s787_s25 = smov 128   ;;  %s788_s26 = smov 8  }
  0x15   :  { %44 = dma.hbm_to_vmem [thread:$0]  %s1040_s1, 256, %s39_s14, [#allocation8], %s787_s25, %s787_s25, %s788_s26  }
  0x16   :  { %s657_s11 = scalar_lea.hbm %s1039_s0, 256 }
  0x17   :  { %p658_p8 = scmp.ne.s32.totalorder %s1039_s0, %s657_s11  ;;  %p661_p9 = scmp.lt.u32.totalorder %s657_s11, %s1039_s0 }
  0x19   :  { %p663_p10 = pnand %p661_p9, %p658_p8 }
  0x1b   :  { %666 = shalt.err (!%p663_p10)
}
  0x1c   :  { %s667_s18 = scalar_lea.vmem %s856_s16, 256  ;;  %p672_p12 = scmp.lt.s32.totalorder %s856_s16, %s856_s16 }
  0x1d   :  { %p668_p11 = scmp.ne.s32.totalorder %s856_s16, %s667_s18  ;;  %p673_p13 = scmp.lt.s32.totalorder %s667_s18, %s667_s18 }
  0x1f   :  { %p674_p0 = por %p673_p13, %p672_p12 }
  0x21   :  { %p675_p1 = pnand %p674_p0, %p668_p11 }
  0x23   :  { %678 = shalt.err (!%p675_p1)
}
  0x24   :  { %32 = dma.hbm_to_vmem [thread:$0]  %s1039_s0, 256, %s856_s16, [#allocation5], %s787_s25, %s787_s25, %s788_s26  }
  0x25   :  { %s789_s19 = smov [#allocation9]   ;;  %s679_s23 = scalar_lea.hbm %s1041_s2, 64 }
  0x26   :  { %s50_s20 = sshll.u32 %s789_s19, 4  ;;  %p680_p2 = scmp.ne.s32.totalorder %s1041_s2, %s679_s23  ;;  %s51_s20 = int_to_ptr.vmem [resolvable:$true] %s50_s20 }
  0x27   :  { %p683_p3 = scmp.lt.u32.totalorder %s679_s23, %s1041_s2 }
  0x29   :  { %p685_p4 = pnand %p683_p3, %p680_p2 }
  0x2b   :  { %688 = shalt.err (!%p685_p4)
}
  0x2c   :  { %s689_s30 = scalar_lea.vmem %s51_s20, 64  ;;  %p694_p6 = scmp.lt.s32.totalorder %s51_s20, %s51_s20 }
  0x2d   :  { %p690_p5 = scmp.ne.s32.totalorder %s51_s20, %s689_s30  ;;  %p695_p7 = scmp.lt.s32.totalorder %s689_s30, %s689_s30 }
  0x2f   :  { %p696_p8 = por %p695_p7, %p694_p6 }
  0x31   :  { %p697_p9 = pnand %p696_p8, %p690_p5 }
  0x33   :  { %700 = shalt.err (!%p697_p9)
}
  0x34   :  { %s790_s0 = smov 32   ;;  %s791_s16 = smov 2  }
  0x35   :  { %56 = dma.hbm_to_vmem [thread:$0]  %s1041_s2, 64, %s51_s20, [#allocation8], %s790_s0, %s790_s0, %s791_s16  }
  0x36   :  { %s792_s13 = smov [#allocation10]   ;;  %s701_s1 = scalar_lea.hbm %s1042_s3, 256 }
  0x37   :  { %s62_s15 = sshll.u32 %s792_s13, 4  ;;  %p702_p10 = scmp.ne.s32.totalorder %s1042_s3, %s701_s1  ;;  %s63_s15 = int_to_ptr.vmem [resolvable:$true] %s62_s15 }
  0x38   :  { %p705_p11 = scmp.lt.u32.totalorder %s701_s1, %s1042_s3 }
  0x3a   :  { %p707_p12 = pnand %p705_p11, %p702_p10 }
  0x3c   :  { %710 = shalt.err (!%p707_p12)
}
  0x3d   :  { %s711_s23 = scalar_lea.vmem %s63_s15, 256  ;;  %p716_p0 = scmp.lt.s32.totalorder %s63_s15, %s63_s15 }
  0x3e   :  { %p712_p13 = scmp.ne.s32.totalorder %s63_s15, %s711_s23  ;;  %p717_p1 = scmp.lt.s32.totalorder %s711_s23, %s711_s23 }
  0x40   :  { %p718_p2 = por %p717_p1, %p716_p0 }
  0x42   :  { %p719_p3 = pnand %p718_p2, %p712_p13 }
  0x44   :  { %722 = shalt.err (!%p719_p3)
}
  0x45   :  { %s793_s2 = smov 64   ;;  %s794_s20 = smov 4  }
  0x46   :  { %68 = dma.hbm_to_vmem [thread:$0]  %s1042_s3, 256, %s63_s15, [#allocation11], %s793_s2, %s793_s2, %s794_s20  }
  0x47   :  { %771 = dma.done.wait [#allocation5], 256  }
  0x48   :  { %772 = vsyncadd [#allocation5], 4294967040 }
  0x49   :  { %773 = dma.done.wait [#allocation8], 320  }
  0x4a   :  { %774 = vsyncadd [#allocation8], 4294966976 }
  0x4b   :  { %775 = dma.done.wait [#allocation11], 256  }
  0x4c   :  { %776 = vsyncadd [#allocation11], 4294967040  ;;  %vm94_vm0 = vcmask 261120   ;;  %v92_v0 = vld [vmem:[#allocation4] sm:$0xff]  ;;  %v93_v1 = vld [vmem:[#allocation4 + $0x8] sm:$0xff]  ;;  %v795_v16 = vmov 0.0   ;;  %v307_v46 = vlaneseq }
  0x4d   :  { %v95_v2 = vsel %vm94_vm0, %v92_v0, 0.0  ;;  %v98_v3 = vsel %vm94_vm0, %v93_v1, 0.0  ;;  %v611_v14 = vld [vmem:[#allocation10] sm:$0xff]   ;;  %v612_v15 = vld [vmem:[%s1044_s5] sm:$0xff]   ;;  %565 = vmatprep.subr.bf16.mxu0 %v795_v16  ;;  %573 = vmatprep.subr.bf16.mxu1 %v795_v16  ;;  %v614_v18 = vld [vmem:[%s1044_s5 + $0x8] sm:$0xff]   ;;  %vm796_vm1 = vmmov 0  }
  0x4e   :  { %96 = vadd.xlane.f32.xlu0 %v95_v2  ;;  %566 = vmatpush3.bf16.msra.mxu0 %v611_v14  ;;  %v613_v17 = vld [vmem:[#allocation10 + $0x8] sm:$0xff]   ;;  %v935_v47 = vshrl.u32 %v307_v46, 7  ;;  %v937_v48 = vand.u32 127, %v307_v46  ;;  %vm294_vm13 = vcmask 257024  }
  0x4f   :  { %574 = vmatpush3.bf16.msra.mxu1 %v612_v15  ;;  %567 = vmatprep.subr.bf16.mxu0 %v795_v16  ;;  %v534_v35 = vld [vmem:[%s1046_s7] ss:$0 sm:$0xff] }
  0x50   :  { %575 = vmatprep.subr.bf16.mxu1 %v795_v16  ;;  %569 = vmatprep.mubr.msk.bf16.mxu0 %vm796_vm1, %v795_v16  ;;  %v535_v41 = vld [vmem:[%s1047_s8] ss:$0 sm:$0xff]  ;;  %v940_v49 = vadd.s32 1, %v935_v47  ;;  %vm316_vm6 = vcmp.le.s32.totalorder %v937_v48, %v935_v47  ;;  %vm317_vm7 = vcmp.ge.s32.totalorder %v937_v48, 1  ;;  %vm311_vm8 = vcmp.eq.s32.totalorder %v937_v48, %v935_v47 }
  0x51   :  { %577 = vmatprep.mubr.msk.bf16.mxu1 %vm796_vm1, %v795_v16  ;;  %vm314_vm10 = vcmp.gt.s32.totalorder %v937_v48, %v935_v47  ;;  %vm315_vm11 = vcmp.lt.s32.totalorder %v935_v47, %v937_v48  ;;  %vm953_vm12 = vmand %vm316_vm6, %vm317_vm7  ;;  %v536_v51 = vld [vmem:[%s1043_s4] ss:$0 sm:$0xff]  ;;  %s963_s4 = smov 0  }
  0x52   :  { %99 = vadd.xlane.f32.xlu0 %v98_v3  ;;  %568 = vmatpush3.bf16.msra.mxu0 %v613_v17  ;;  %vm313_vm9 = vcmp.eq.s32.totalorder %v937_v48, %v940_v49  ;;  %v540_v52 = vld [vmem:[%s1045_s6] ss:$0 sm:$0xff] }
  0x53   :  { %576 = vmatpush3.bf16.msra.mxu1 %v614_v18 }
  0xdb   :  { %v97_v4 = vpop.xlane.xlu0 %96 }
  0xdc   :  { %v102_v5 = vmul.f32 0.03125, %v97_v4 }
  0xde   :  { %v104_v6 = vsub.f32 %v92_v0, %v102_v5 }
  0xdf   :  { %v100_v7 = vpop.xlane.xlu0 %99 }
  0xe0   :  { %v103_v8 = vmul.f32 0.03125, %v100_v7  ;;  %v106_v9 = vmul.f32 %v104_v6, %v104_v6  ;;  %v141_v37 = vmul.f32 %v534_v35, %v104_v6 }
  0xe2   :  { %v105_v10 = vsub.f32 %v93_v1, %v103_v8  ;;  %v108_v11 = vsel %vm94_vm0, %v106_v9, 0.0 }
  0xe3   :  { %109 = vadd.xlane.f32.xlu1 %v108_v11 }
  0xe4   :  { %v107_v12 = vmul.f32 %v105_v10, %v105_v10  ;;  %v142_v38 = vmul.f32 %v534_v35, %v105_v10 }
  0xe6   :  { %v111_v13 = vsel %vm94_vm0, %v107_v12, 0.0 }
  0xe7   :  { %112 = vadd.xlane.f32.xlu1 %v111_v13 }
 0x170   :  { %v110_v19 = vpop.xlane.xlu1 %109 }
 0x171   :  { %v114_v20 = vmul.f32 0.032258064, %v110_v19 }
 0x173   :  { %615 = vrsqrt.f32 %v114_v20  ;;  %vm118_vm2 = vcmp.eq.f32.partialorder %v114_v20, inf  ;;  %v121_v25 = vand.u32 2147483648, %v114_v20  ;;  %vm120_vm3 = vcmp.eq.f32.partialorder %v114_v20, 0.0 }
 0x174   :  { %v113_v21 = vpop.xlane.xlu1 %112 }
 0x175   :  { %v115_v22 = vmul.f32 0.032258064, %v113_v21 }
 0x177   :  { %617 = vrsqrt.f32 %v115_v22  ;;  %vm125_vm4 = vcmp.eq.f32.partialorder %v115_v22, inf  ;;  %v128_v31 = vand.u32 2147483648, %v115_v22  ;;  %vm127_vm5 = vcmp.eq.f32.partialorder %v115_v22, 0.0 }
 0x17d   :  { %v616_v23 = vpop.eup %615 }
 0x17e   :  { %v117_v24 = vmul.f32 %v616_v23, %v114_v20 }
 0x180   :  { %v119_v26 = vsel %vm118_vm2, %v114_v20, %v117_v24 }
 0x181   :  { %v618_v27 = vpop.eup %617  ;;  %v122_v28 = vsel %vm120_vm3, %v121_v25, %v119_v26 }
 0x182   :  { %v130_v29 = vadd.f32 1e-06, %v122_v28  ;;  %v124_v30 = vmul.f32 %v618_v27, %v115_v22 }
 0x184   :  { %619 = vrcp.f32 %v130_v29  ;;  %v126_v32 = vsel %vm125_vm4, %v115_v22, %v124_v30 }
 0x185   :  { %v129_v33 = vsel %vm127_vm5, %v128_v31, %v126_v32 }
 0x186   :  { %v131_v34 = vadd.f32 1e-06, %v129_v33 }
 0x188   :  { %621 = vrcp.f32 %v131_v34 }
 0x18e   :  { %v620_v36 = vpop.eup %619 }
 0x18f   :  { %v143_v39 = vmul.f32 %v620_v36, %v141_v37 }
 0x191   :  { %v152_v43 = vadd.f32 %v535_v41, %v143_v39 }
 0x192   :  { %v622_v40 = vpop.eup %621 }
 0x193   :  { %v144_v42 = vmul.f32 %v622_v40, %v142_v38 }
 0x195   :  { %v153_v44 = vadd.f32 %v535_v41, %v144_v42 }
 0x197   :  { %v154_v45 = vpack.c.bf16 %v153_v44, %v152_v43 }
 0x199   :  { %570 = vmatmul.mubr.msk.bf16.vlgmr.msra.gmra.mrb[0].mxu0 %vm94_vm0, %v154_v45  ;;  %578 = vmatmul.mubr.msk.bf16.vlgmr.msra.gmra.mrb[0].mxu1 %vm94_vm0, %v154_v45 }
 0x26c   :  { %v215_v53 = vpop.f32.mrb[0].mxu0  ;;  %v279_v54 = vpop.f32.mrb[0].mxu1 }
 0x26d   :  { %v216_v55 = vadd.f32 %v536_v51, %v215_v53  ;;  %v280_v56 = vadd.f32 %v540_v52, %v279_v54  ;;  %v571_v57 = vpop.f32.mrb[1].mxu0  ;;  %v579_v58 = vpop.f32.mrb[1].mxu1 }
 0x26e   :  { %v218_v59 = vpop.f32.mrb[2].mxu0  ;;  %v282_v60 = vpop.f32.mrb[2].mxu1 }
 0x26f   :  { %v553_v61 = vpack.c.bf16 %v216_v55, %v216_v55  ;;  %v555_v62 = vpack.c.bf16 %v280_v56, %v280_v56  ;;  %v219_v63 = vadd.f32 %v536_v51, %v218_v59  ;;  %v283_v0 = vadd.f32 %v540_v52, %v282_v60  ;;  %v572_v1 = vpop.f32.mrb[3].mxu0  ;;  %v580_v2 = vpop.f32.mrb[3].mxu1 }
 0x271   :  { %295 = vst.msk [vmem:[#allocation2] sm:$0xf] %vm294_vm13, %v553_v61  ;;  %305 = vst.msk [vmem:[#allocation3] sm:$0xf] %vm294_vm13, %v555_v62  ;;  %v554_v3 = vpack.c.bf16 %v219_v63, %v219_v63  ;;  %v556_v4 = vpack.c.bf16 %v283_v0, %v283_v0 }
 0x273   :  { %296 = vst.msk [vmem:[#allocation2 + $0x4] sm:$0xf] %vm294_vm13, %v554_v3  ;;  %306 = vst.msk [vmem:[#allocation3 + $0x4] sm:$0xf] %vm294_vm13, %v556_v4 }
 0x274 LB: > { %v797_v5 = vmov 0.0   ;;  %vm798_vm14 = vmmov 0   ;;  %s548_s6 = sshll.u32 %s783_s4, 2  ;;  %s551_s18 = sshll.u32 %s783_s4, 1  ;;  %vm384_vm1 = vcmask 64512   ;;  %s783_s4 = sphi %s963_s4, %s324_s4  }
 0x275   : > { %581 = vmatprep.subr.bf16.mxu0 %v797_v5  ;;  %583 = vmatprep.mubr.msk.bf16.mxu0 %vm798_vm14, %v797_v5  ;;  %s329_s15 = scalar_lea.vmem [#allocation3], %s548_s6  ;;  %s326_s17 = scalar_lea.vmem [#allocation2], %s548_s6 }
 0x276   : > { %s379_s1 = scalar_lea.vmem [#allocation9], %s551_s18  ;;  %s975_s14 = sshll.u32 %s783_s4, 3 }
 0x277   : > { %v380_v9 = vld [vmem:[%s379_s1] sm:$0x3]  ;;  %s438_s19 = scalar_lea.vmem [#allocation7], %s975_s14  ;;  %s480_s21 = scalar_lea.vmem [#allocation13], %s975_s14 }
 0x278   : > { %v381_v10 = vunpack.c.0.s8 %v380_v9  ;;  %v439_v29 = vld [vmem:[%s438_s19] sm:$0xff]  ;;  %s478_s22 = scalar_lea.vmem [#allocation12], %s975_s14  ;;  %s324_s4 = sadd.s32 1, %s783_s4  }
 0x279   : > { %v440_v32 = vsub.f32 1.0, %v439_v29  ;;  %p321_p4 = scmp.ge.s32.totalorder %s324_s4, 2  }
 0x27a   : > { %v330_v6 = vld [vmem:[%s329_s15] sm:$0xf]  ;;  %vm382_vm15 = vcmp.ne.s32.totalorder %v381_v10, 0  ;;  %s799_s23 = smov (%p321_p4), [#allocation12]   ;;  %s800_s20 = smov (%p321_p4), [#allocation13]  }
 0x27b   : > { %v335_v7 = vsel %vm94_vm0, %v330_v6, 0  ;;  %v327_v8 = vld [vmem:[%s326_s17] sm:$0xf]  ;;  %s487_s2 = sshll.u32 (%p321_p4), %s799_s23, 4  ;;  %s499_s24 = sshll.u32 (%p321_p4), %s800_s20, 4  ;;  %s488_s2 = int_to_ptr.vmem [resolvable:$true] %s487_s2  ;;  %s1002_s24 = int_to_ptr.vmem [resolvable:$true] %s499_s24 }
 0x27c   : > { %582 = vmatpush3.bf16.xpose.msra.mxu0 %v335_v7  ;;  %s723_s27 = scalar_lea.vmem (%p321_p4), %s488_s2, 256  ;;  %p728_p6 = scmp.lt.s32.totalorder (%p321_p4), %s488_s2, %s488_s2 }
 0x27d   :  { %p724_p5 = scmp.ne.s32.totalorder (%p321_p4), %s488_s2, %s723_s27  ;;  %p729_p7 = scmp.lt.s32.totalorder (%p321_p4), %s723_s27, %s723_s27 }
 0x27f   :  { %p730_p8 = por (%p321_p4), %p729_p7, %p728_p6 }
 0x281   :  { %p731_p9 = pnand (%p321_p4), %p730_p8, %p724_p5 }
 0x283   : > { %584 = vmatmul.mubr.msk.bf16.vlgmr.msra.gmra.mrb[0].mxu0 %vm94_vm0, %v327_v8 }
 0x356   : > { %v371_v11 = vpop.f32.mrb[0].mxu0 }
 0x357   : > { %v377_v12 = vmul.f32 0.0625, %v371_v11  ;;  %v585_v13 = vpop.f32.mrb[1].mxu0 }
 0x358   : > { %v374_v14 = vpop.f32.mrb[2].mxu0 }
 0x359   : > { %v586_v15 = vpop.f32.mrb[3].mxu0  ;;  %v383_v16 = vsel %vm382_vm15, %v377_v12, -1e+09 }
 0x35a   : > { %v385_v17 = vsel %vm384_vm1, %v383_v16, -inf }
 0x35b   : > { %386 = vmax.xlane.f32.xlu0 %v385_v17 }
 0x3e8   : > { %v387_v18 = vpop.xlane.xlu0 %386 }
 0x3e9   : > { %v388_v19 = vsub.f32 %v383_v16, %v387_v18 }
 0x3eb   : > { %v389_v20 = vmul.f32 1.442695, %v388_v19 }
 0x3ed   : > { %623 = vpow2.f32 %v389_v20 }
 0x3f7   : > { %v624_v21 = vpop.eup %623 }
 0x3f8   : > { %v391_v22 = vsel %vm384_vm1, %v624_v21, 0.0 }
 0x3f9   : > { %392 = vadd.xlane.f32.xlu0 %v391_v22 }
 0x486   : > { %v393_v23 = vpop.xlane.xlu0 %392 }
 0x487   : > { %625 = vrcp.f32 %v393_v23 }
 0x491   : > { %v626_v24 = vpop.eup %625 }
 0x492   : > { %v395_v25 = vmul.f32 %v626_v24, %v624_v21 }
 0x494   : > { %396 = vxpose.xlu1.b32.start.end [1/1] (short) (narrow) %v395_v25, 8 }
 0x514   : > { %v412_v26 = vpop.trf.xlu1 }
 0x515   : > { %v428_v27 = vmul.f32 %v412_v26, %v395_v25 }
 0x517   : > { %v429_v28 = vadd.f32 1e-09, %v428_v27 }
 0x519   : > { %627 = vrsqrt.f32 %v429_v28  ;;  %vm432_vm2 = vcmp.eq.f32.partialorder %v429_v28, inf  ;;  %v435_v33 = vand.u32 2147483648, %v429_v28  ;;  %vm434_vm3 = vcmp.eq.f32.partialorder %v429_v28, 0.0 }
 0x523   : > { %v628_v30 = vpop.eup %627 }
 0x524   : > { %v431_v31 = vmul.f32 %v628_v30, %v429_v28 }
 0x526   : > { %v433_v34 = vsel %vm432_vm2, %v429_v28, %v431_v31 }
 0x527   : > { %v436_v35 = vsel %vm434_vm3, %v435_v33, %v433_v34 }
 0x528   : > { %v441_v36 = vmul.f32 %v440_v32, %v436_v35 }
 0x52a   : > { %v442_v37 = vadd.f32 %v441_v36, %v439_v29 }
 0x52c   : > { %v443_v38 = vsel %vm313_vm9, %v442_v37, 0.0  ;;  %481 = vst.msk [vmem:[%s480_s21] sm:$0xff] %vm384_vm1, %v442_v37 }
 0x52d   : > { %v444_v39 = vsel %vm384_vm1, %v443_v38, 0.0 }
 0x52e   : > { %445 = vadd.xlane.f32.xlu1 %v444_v39  ;;  %v447_v40 = vrot.slane %v444_v39, 4 }
 0x530   : > { %v448_v41 = vadd.f32 %v447_v40, %v444_v39 }
 0x532   : > { %v449_v42 = vrot.slane %v448_v41, 2 }
 0x534   : > { %v450_v43 = vadd.f32 %v449_v42, %v448_v41 }
 0x536   : > { %v451_v44 = vrot.slane %v450_v43, 1 }
 0x538   : > { %v452_v45 = vadd.f32 %v451_v44, %v450_v43 }
 0x53a   : > { %v456_v46 = vadd.f32 1e-09, %v452_v45 }
 0x53c   : > { %629 = vlog2.f32 %v456_v46 }
 0x546   : > { %v630_v51 = vpop.eup %629 }
 0x547   : > { %v458_v52 = vmul.f32 0.6931472, %v630_v51 }
 0x549   : > { %v467_v53 = vsel %vm953_vm12, %v458_v52, 0.0 }
 0x54a   : > { %v468_v54 = vsel %vm384_vm1, %v467_v53, 0.0 }
 0x54b   : > { %469 = vadd.xlane.f32.xlu0 %v468_v54 }
 0x5bb   : > { %v446_v55 = vpop.xlane.xlu1 %445 }
 0x5bc   : > { %v453_v56 = vadd.f32 1e-09, %v446_v55 }
 0x5be   : > { %631 = vlog2.f32 %v453_v56 }
 0x5c8   : > { %v632_v57 = vpop.eup %631 }
 0x5c9   : > { %v455_v58 = vmul.f32 0.6931472, %v632_v57 }
 0x5cb   : > { %v459_v59 = vsel %vm315_vm11, %v455_v58, 0.0 }
 0x5cc   : > { %v460_v60 = vsel %vm384_vm1, %v459_v59, 0.0 }
 0x5cd   : > { %v461_v61 = vrot.slane %v460_v60, 4 }
 0x5cf   : > { %v462_v62 = vadd.f32 %v461_v61, %v460_v60 }
 0x5d1   : > { %v463_v63 = vrot.slane %v462_v62, 2 }
 0x5d3   : > { %v464_v0 = vadd.f32 %v463_v63, %v462_v62 }
 0x5d5   : > { %v465_v1 = vrot.slane %v464_v0, 1 }
 0x5d7   : > { %v466_v2 = vadd.f32 %v465_v1, %v464_v0 }
 0x5d8   : > { %v470_v3 = vpop.xlane.xlu0 %469 }
 0x5d9   : > { %v471_v4 = vsub.f32 %v466_v2, %v470_v3 }
 0x5db   : > { %v472_v5 = vsub.f32 0.0, %v471_v4 }
 0x5dd   : > { %v473_v6 = vsel %vm314_vm10, %v471_v4, %v472_v5 }
 0x5de   : > { %v474_v7 = vmul.f32 1.442695, %v473_v6 }
 0x5e0   : > { %633 = vpow2.f32 %v474_v7 }
 0x5e8   :  { %323 = sbr.rel (!%p321_p4) target bundleno = 628 (0x274), region = 93 }
 0x5ea   : > { %v634_v8 = vpop.eup %633 }
 0x5eb   : > { %v476_v9 = vadd.f32 1e-09, %v634_v8 }
 0x5ed   : > { %v477_v10 = vsel %vm311_vm8, %v442_v37, %v476_v9 }
 0x5ee   : > { %479 = vst.msk [vmem:[%s478_s22] sm:$0xff] %vm384_vm1, %v477_v10 }
 0x5ef   :  { %734 = shalt.err (!%p731_p9)
}
 0x5f0   :  { %s735_s29 = scalar_lea.hbm %s1048_s9, 256 }
 0x5f1   :  { %p736_p10 = scmp.ne.s32.totalorder %s1048_s9, %s735_s29  ;;  %p739_p11 = scmp.lt.u32.totalorder %s735_s29, %s1048_s9 }
 0x5f3   :  { %p741_p12 = pnand %p739_p11, %p736_p10 }
 0x5f5   :  { %744 = shalt.err (!%p741_p12)
}
 0x5f6   :  { %493 = dma.vmem_to_hbm [thread:$0]  %s488_s2, 256, %s1048_s9, [#allocation6], %s787_s25, %s787_s25, %s788_s26  }
 0x5f7   :  { %s745_s8 = scalar_lea.vmem %s1002_s24, 256  ;;  %p750_p0 = scmp.lt.s32.totalorder %s1002_s24, %s1002_s24 }
 0x5f8   :  { %p746_p13 = scmp.ne.s32.totalorder %s1002_s24, %s745_s8  ;;  %p751_p1 = scmp.lt.s32.totalorder %s745_s8, %s745_s8 }
 0x5fa   :  { %p752_p2 = por %p751_p1, %p750_p0 }
 0x5fc   :  { %p753_p3 = pnand %p752_p2, %p746_p13 }
 0x5fe   :  { %756 = shalt.err (!%p753_p3)
}
 0x5ff   :  { %s757_s4 = scalar_lea.hbm %s1049_s10, 256 }
 0x600   :  { %p758_p4 = scmp.ne.s32.totalorder %s1049_s10, %s757_s4  ;;  %p761_p5 = scmp.lt.u32.totalorder %s757_s4, %s1049_s10 }
 0x602   :  { %p763_p6 = pnand %p761_p5, %p758_p4 }
 0x604   :  { %766 = shalt.err (!%p763_p6)
}
 0x605   :  { %505 = dma.vmem_to_hbm [thread:$0]  %s1002_s24, 256, %s1049_s10, [#allocation14], %s787_s25, %s787_s25, %s788_s26  }
 0x606   :  { %777 = dma.done.wait [#allocation6], 256  }
 0x607   :  { %778 = vsyncadd [#allocation6], 4294967040 }
 0x608   :  { %779 = dma.done.wait [#allocation14], 256  }
 0x609   :  { %780 = vsyncadd [#allocation14], 4294967040 }
 0x60a   :  { %512 = vsyncpa [#allocation5], 1 }
 0x60b   :  { %513 = vsyncpa [#allocation8], 1 }
 0x60c   :  { %514 = vsyncpa [#allocation11], 1 }
 0x60d   :  { %515 = vsyncpa [#allocation6], 1 }
 0x60e   :  { %516 = vsyncpa [#allocation14], 1 }

</bundles_post_ra>
